<compile_context>
chip_gen: v5e
topology: v5e:2x2
jax: 0.10.0
libtpu: 0.0.40
codegen_flags: <defaults>
</compile_context>

<pallas_src>
import jax
import jax.numpy as jnp
from jax.experimental import pallas as pl
from jax.experimental.pallas import tpu as pltpu


def _round_up(v, m):
    return ((v + m - 1) // m) * m


def _fr_kernel(a_ref, w_ref, b_ref, o_ref):
    """One (bn images, ts spatial columns) block.

    a_ref: (bn, 2*C_in, ts)  activations, path1/path2 channels stacked, spatial on lanes
    w_ref: (C_out, 2*C_in)   block-diagonal BN-folded 1x1-conv weights (VMEM resident)
    b_ref: (C_out, 1)        folded-BN shift
    o_ref: (bn, C_out, ts)   NCHW-flattened output block (lane-dense store)
    """
    w = w_ref[...]
    bias = b_ref[...]
    for b in range(a_ref.shape[0]):                    # small static unroll over images
        y = jnp.dot(w, a_ref[b], preferred_element_type=jnp.float32)
        o_ref[b] = (y + bias).astype(o_ref.dtype)


def _pick_tiles(n, s, c2in, c_out, itemsize,
                tile_budget_bytes=24 * 1024 * 1024,
                step_target_bytes=8 * 1024 * 1024,
                max_batch_block=32):
    """Pick (bn, ts) = (images per block, spatial columns per block).

    VMEM accounting uses physical sizes: channel (sublane) dims round up to the sublane
    granularity of the dtype, lane dims to 128; resident weights/bias and double-buffering
    are included.  Grid is kept at >=2 steps so v7x's two TensorCores both get work.
    """
    subl = max(8, 32 // max(itemsize, 1))               # 8 f32, 16 bf16, 32 int8/fp8
    c2_pad = _round_up(c2in, subl)
    co_pad = _round_up(c_out, subl)
    w_bytes = 2 * co_pad * _round_up(c2in, 128) * itemsize + 2 * co_pad * 128 * 4
    budget = max(tile_budget_bytes - w_bytes, 2 * 1024 * 1024)
    per_col = 2 * (c2_pad + co_pad) * itemsize           # x2 = double buffering (in + out)
    ts = budget // per_col
    ts = s if ts >= s else max(128, (ts // 128) * 128)
    per_img = 2 * (c2_pad + co_pad) * ts * itemsize
    bn = max(1, min(n, max_batch_block,
                    step_target_bytes // max(per_img, 1),
                    budget // max(per_img, 1)))
    if bn >= n and ts >= s:                               # would be a single grid step
        if n >= 2:
            bn = (n + 1) // 2
        elif s >= 256:
            ts = _round_up((s + 1) // 2, 128)
    return bn, ts


def factorized_reduce(x, w1, w2, gamma, beta, running_mean, running_var, eps=1e-5):
    """
    x:  (N, C_in, H, W)
    w1, w2: (C_out//2, C_in) 1x1-conv weights (bias=False)
    gamma, beta, running_mean, running_var: (C_out,) BatchNorm params (inference mode)
    returns (N, C_out, ceil(H/2), ceil(W/2))
    """
    N, C_in, H, W = x.shape
    Co2 = w1.shape[0]
    C_out = 2 * Co2
    Ho, Wo = (H + 1) // 2, (W + 1) // 2
    S = Ho * Wo
    C2 = 2 * C_in

    # AvgPool2d(1, stride=2) is a pure subsample; stay in NCHW so the kernel output is
    # directly NCHW (no layout transposes through HBM).
    p1 = x[:, :, ::2, ::2]                                                 # even pixels
    p2 = jnp.pad(x, ((0, 0), (0, 0), (0, 1), (0, 1)))[:, :, 1::2, 1::2]    # odd pixels (+0 border)
    a = jnp.concatenate([p1, p2], axis=1).reshape(N, C2, S)                # (N, 2*C_in, S)

    # Fold inference BN into the conv weights and a per-channel shift; block-diagonal weight so
    # both 1x1 convs (and the channel concat) become a single MXU matmul.
    scale = gamma / jnp.sqrt(running_var + eps)                            # (C_out,)
    shift = beta - running_mean * scale                                    # (C_out,)
    w1m = w1 * scale[:Co2, None]
    w2m = w2 * scale[Co2:, None]
    z = jnp.zeros((Co2, C_in), dtype=w1m.dtype)
    wblk = jnp.concatenate(
        [jnp.concatenate([w1m, z], axis=1),
         jnp.concatenate([z, w2m], axis=1)], axis=0).astype(x.dtype)       # (C_out, 2*C_in)
    bias = shift.reshape(C_out, 1).astype(jnp.float32)

    itemsize = jnp.dtype(x.dtype).itemsize
    bn, ts = _pick_tiles(N, S, C2, C_out, itemsize)
    grid = (pl.cdiv(N, bn), pl.cdiv(S, ts))

    out = pl.pallas_call(
        _fr_kernel,
        out_shape=jax.ShapeDtypeStruct((N, C_out, S), x.dtype),
        grid_spec=pltpu.PrefetchScalarGridSpec(
            num_scalar_prefetch=0,
            grid=grid,
            in_specs=[
                pl.BlockSpec((bn, C2, ts), lambda n, s: (n, 0, s)),   # activations (streamed)
                pl.BlockSpec((C_out, C2), lambda n, s: (0, 0)),       # weights (VMEM resident)
                pl.BlockSpec((C_out, 1), lambda n, s: (0, 0)),        # folded-BN shift
            ],
            out_specs=pl.BlockSpec((bn, C_out, ts), lambda n, s: (n, 0, s)),
        ),
        compiler_params=pltpu.CompilerParams(
            dimension_semantics=("parallel", "parallel"),             # 2 axes -> v7x 2-TC sharding
            vmem_limit_bytes=32 * 1024 * 1024,                        # safe on v5e/v6e/v7x
            allow_input_fusion=[True, False, False],                  # fuse gather into operand 0
        ),
    )(a, wblk, bias)

    # Pure reshape -> NCHW; no transpose needed.
    return out.reshape(N, C_out, Ho, Wo)


def factorized_reduce_ref(x, w1, w2, gamma, beta, running_mean, running_var, eps=1e-5):
    """Pure-JAX reference mirroring the PyTorch module (inference BN)."""
    p1 = x[:, :, ::2, ::2]
    xs = jnp.pad(x, ((0, 0), (0, 0), (0, 1), (0, 1)))[:, :, 1:, 1:]
    p2 = xs[:, :, ::2, ::2]
    hi = jax.lax.Precision.HIGHEST
    y1 = jnp.einsum("nchw,oc->nohw", p1, w1, precision=hi)
    y2 = jnp.einsum("nchw,oc->nohw", p2, w2, precision=hi)
    y = jnp.concatenate([y1, y2], axis=1)
    scale = (gamma / jnp.sqrt(running_var + eps)).reshape(1, -1, 1, 1)
    shift = (beta - running_mean * gamma / jnp.sqrt(running_var + eps)).reshape(1, -1, 1, 1)
    return y * scale + shift


if __name__ == "__main__":
    key = jax.random.PRNGKey(0)
    k1, k2, k3, k4, k5, k6, k7 = jax.random.split(key, 7)

    N, C_in, H, W = 2, 4, 16, 16
    C_out = 8
    Co2 = C_out // 2

    x = jax.random.normal(k1, (N, C_in, H, W), dtype=jnp.float32)
    w1 = jax.random.normal(k2, (Co2, C_in), dtype=jnp.float32) * 0.3
    w2 = jax.random.normal(k3, (Co2, C_in), dtype=jnp.float32) * 0.3
    gamma = 1.0 + 0.1 * jax.random.normal(k4, (C_out,), dtype=jnp.float32)
    beta = 0.1 * jax.random.normal(k5, (C_out,), dtype=jnp.float32)
    running_mean = 0.1 * jax.random.normal(k6, (C_out,), dtype=jnp.float32)
    running_var = jax.random.uniform(k7, (C_out,), dtype=jnp.float32, minval=0.5, maxval=1.5)

    fr = jax.jit(factorized_reduce)   # jit so the gather can fuse into the pallas operand
    y = fr(x, w1, w2, gamma, beta, running_mean, running_var)
    jax.block_until_ready(y)

    y_ref = factorized_reduce_ref(x, w1, w2, gamma, beta, running_mean, running_var)

    assert y.shape == (N, C_out, H // 2, W // 2), y.shape
    assert y.dtype == x.dtype
    max_err = float(jnp.max(jnp.abs(y - y_ref)))
    assert jnp.allclose(y, y_ref, atol=1e-3, rtol=1e-3), max_err
    print("KERNEL_OK")
</pallas_src>

<mosaic_0001>
module attributes {stable_mosaic.version = 11 : i64} {
  func.func @_fr_kernel(%arg0: i32, %arg1: i32, %arg2: memref<1x8x64xf32, #tpu.memory_space<vmem>>, %arg3: memref<8x8xf32, #tpu.memory_space<vmem>>, %arg4: memref<8x1xf32, #tpu.memory_space<vmem>>, %arg5: memref<1x8x64xf32, #tpu.memory_space<vmem>>) attributes {dimension_semantics = [#tpu.dimension_semantics<parallel>, #tpu.dimension_semantics<parallel>], iteration_bounds = array<i64: 2, 1>, scalar_prefetch = 0 : i64, scratch_operands = 0 : i64, tpu.core_type = #tpu.core_type<tc>, window_params = [{transform_indices = @transform_0, window_bounds = array<i64: 1, 8, 64>}, {pipeline_mode = #tpu.pipeline_mode<synchronous>, transform_indices = @transform_1, window_bounds = array<i64: 8, 8>}, {pipeline_mode = #tpu.pipeline_mode<synchronous>, transform_indices = @transform_2, window_bounds = array<i64: 8, 1>}, {transform_indices = @transform_3, window_bounds = array<i64: 1, 8, 64>}]} {
    %c0 = arith.constant 0 : index
    %c0_0 = arith.constant 0 : index
    %0 = vector.load %arg3[%c0, %c0_0] : memref<8x8xf32, #tpu.memory_space<vmem>>, vector<8x8xf32>
    %c0_1 = arith.constant 0 : index
    %c0_2 = arith.constant 0 : index
    %1 = vector.load %arg4[%c0_1, %c0_2] : memref<8x1xf32, #tpu.memory_space<vmem>>, vector<8x1xf32>
    %c0_3 = arith.constant 0 : index
    %c0_4 = arith.constant 0 : index
    %c0_5 = arith.constant 0 : index
    %2 = vector.load %arg2[%c0_3, %c0_4, %c0_5] : memref<1x8x64xf32, #tpu.memory_space<vmem>>, vector<1x8x64xf32>
    %3 = vector.shape_cast %2 : vector<1x8x64xf32> to vector<8x64xf32>
    %cst = arith.constant dense<0.000000e+00> : vector<8x64xf32>
    %4 = tpu.matmul %0, %3, %cst {dimension_numbers = #tpu.dot_dimension_numbers<[1], [0], [0], [1], [0, 0, 1, 1], [], []>} : vector<8x8xf32>, vector<8x64xf32>, vector<8x64xf32> -> vector<8x64xf32>
    %5 = vector.broadcast %1 : vector<8x1xf32> to vector<8x64xf32>
    %6 = arith.addf %4, %5 : vector<8x64xf32>
    %c0_6 = arith.constant 0 : index
    %c0_7 = arith.constant 0 : index
    %c0_8 = arith.constant 0 : index
    %7 = vector.load %arg5[%c0_6, %c0_7, %c0_8] : memref<1x8x64xf32, #tpu.memory_space<vmem>>, vector<1x8x64xf32>
    %8 = vector.shape_cast %7 : vector<1x8x64xf32> to vector<8x64xf32>
    %9 = vector.shape_cast %6 : vector<8x64xf32> to vector<1x8x64xf32>
    tpu.vector_store %arg5[%c0_6, %c0_7, %c0_8], %9 {strides = array<i32>} : memref<1x8x64xf32, #tpu.memory_space<vmem>>, vector<1x8x64xf32>,
    return
  }
  func.func @transform_0(%arg0: i32, %arg1: i32) -> (i32, i32, i32) {
    %c0_i32 = arith.constant 0 : i32
    %c0_i32_0 = arith.constant 0 : i32
    return %arg0, %c0_i32, %arg1 : i32, i32, i32
  }
  func.func @transform_1(%arg0: i32, %arg1: i32) -> (i32, i32) {
    %c0_i32 = arith.constant 0 : i32
    %c0_i32_0 = arith.constant 0 : i32
    %c0_i32_1 = arith.constant 0 : i32
    return %c0_i32, %c0_i32_0 : i32, i32
  }
  func.func @transform_2(%arg0: i32, %arg1: i32) -> (i32, i32) {
    %c0_i32 = arith.constant 0 : i32
    %c0_i32_0 = arith.constant 0 : i32
    %c0_i32_1 = arith.constant 0 : i32
    return %c0_i32, %c0_i32_0 : i32, i32
  }
  func.func @transform_3(%arg0: i32, %arg1: i32) -> (i32, i32, i32) {
    %c0_i32 = arith.constant 0 : i32
    %c0_i32_0 = arith.constant 0 : i32
    return %arg0, %c0_i32, %arg1 : i32, i32, i32
  }
}

</mosaic_0001>

<bundles_post_ra>
// kernel: factorized_reduce.1
= control target key start
LH: loop header
LB: loop body
LE: loop exit
PB: predicated region body
PF: predicated region fallthrough
CT: control target
= control target key end

     0   :  { %s386_s12 = smov 0   ;;  %s388_s13 = smov 0   ;;  %s422_s0 = inlined_call_operand.vmem [shape: f32[2,8,64], index: 0, kind: input, shape index: {}]   ;;  %s423_s1 = inlined_call_operand.vmem [shape: f32[8,8], index: 1, kind: input, shape index: {}]   ;;  %s424_s2 = inlined_call_operand.vmem [shape: f32[8,1], index: 2, kind: input, shape index: {}]   ;;  %s425_s3 = inlined_call_operand.vmem [shape: f32[2,8,64], index: 3, kind: output, shape index: {}]  }
   0x1   :  { %s390_s14 = smov 0  }
   0x2 LB: > { %s25_s15 = sadd.s32 1, %s359_s13  ;;  %p309_p0 = scmp.ge.s32.totalorder %s363_s14, 1  ;;  %s363_s14 = sphi %s390_s14, %s13_s14   ;;  %s359_s13 = sphi %s388_s13, %s427_s13   ;;  %s355_s12 = sphi %s386_s12, %s426_s12  }
   0x3   : > { %p27_p1 = scmp.ge.s32.totalorder %s25_s15, 2  ;;  %p155_p2 = scmp.lt.s32.totalorder %s363_s14, 3 }
   0x5   : > { %s429_s15 = smov (%p27_p1, %s25_s15), 0  ;;  %p156_p3 = pnand %p309_p0, %p155_p2 }
   0x6   : > { %p183_p4 = scmp.lt.s32.totalorder (!%p156_p3), %s355_s12, 1 }
   0x7   : > { %159 = sbr.rel (%p156_p3) target bundleno = 146 (0x92), region = 32 }
   0xc   : > { %v198_v0 = vld [vmem:[%s424_s2] sm:$0xff]  ;;  %v365_v1 = vmov 0   ;;  %s431_s12 = smov (!%p183_p4, %s355_s12), 1  ;;  %vm205_vm0 = vcmask 64512   ;;  %vm229_vm1 = vcmask 523264  }
   0xd   : > { %340 = vset.pattern.permute.xlu0 %v365_v1  ;;  %s310_s18 = sshll.u32 %s431_s12, 3  ;;  %v197_v2 = vld [vmem:[%s423_s1] sm:$0xff] }
   0xe   : > { %202 = vperm.xlu0 %340, %v198_v0   ;;  %s189_s21 = scalar_lea.vmem %s422_s0, %s310_s18  ;;  %s196_s26 = scalar_lea.vmem %s425_s3, %s310_s18 }
   0xf   : > { %v199_v3 = vld [vmem:[%s189_s21] sm:$0xff] }
  0x10   : > { %224 = vmatpush.msra.mxu0 %v199_v3 }
  0x11   : > { %312 = vmatmul.msk.f32.vlgmr.msra.gmra.mxu0 %vm205_vm0, %v197_v2 }
  0x80   : > { %v203_v4 = vpop.permute.xlu0 %202 }
  0x8e   : > { %v226_v5 = vpop.f32.mrf.mxu0 }
  0x8f   : > { %v227_v6 = vadd.f32 %v226_v5, %v203_v4 }
  0x91   : > { %230 = vst.msk [vmem:[%s196_s26] sm:$0xff] %vm229_vm1, %v227_v6 }
  0x92 PF: > { %s13_s14 = sadd.s32 1, %s363_s14   ;;  %s426_s12 = smov %s359_s13 }
  0x93   : > { %p10_p5 = scmp.ge.s32.totalorder %s13_s14, 4   ;;  %s427_s13 = smov %s429_s15 }
  0x95   :  { %12 = sbr.rel (!%p10_p5) target bundleno = 2 (0x2), region = 62 }

</bundles_post_ra>
